<compile_context>
chip_gen: v5e
topology: v5e:2x2
jax: 0.10.0
libtpu: 0.0.40
codegen_flags: <defaults>
</compile_context>

<pallas_src>
import math
import functools

import jax
import jax.numpy as jnp
from jax import lax
from jax.experimental import pallas as pl
from jax.experimental.pallas import tpu as pltpu


def _axis_phase_map(K, s, p):
    """Static polyphase bookkeeping for one spatial axis.

    Output index o (phase r = o mod s, quotient c = o // s) receives tap k iff
    k == (r + p) mod s; it then reads input index  c + off  with
    off = (r + p - k) // s  (exact division).  Returns {k: (r, off)}, off_min, span.
    """
    m = {}
    for k in range(K):
        r = (k - p) % s
        off = (r + p - k) // s
        m[k] = (r, off)
    offs = [o for (_, o) in m.values()]
    omin, omax = min(offs), max(offs)
    return m, omin, omax - omin + 1


def _convt_kernel(x_ref, w_ref, b_ref, o_ref, *scratch,
                  taps, Ci, Wp, row_chunk, n_chunks, per_tap):
    """One grid step computes the whole (phase-major) output for one batch element.

    x_ref : (1, Ci, Hp*Wp)          un-dilated, edge-padded input, flattened
    w_ref : (s*s*Co, n_taps*Ci)     polyphase-packed weight
    b_ref : (s*s*Co, 1)             phase-tiled bias (f32)
    o_ref : (1, s*s*Co, Hq_alloc*Wp) phase-major flattened output
    scratch: optional (n_taps*Ci, row_chunk*Wp) VMEM slab (small-Cin path only)
    """
    w = w_ref[...]                       # load packed weight once
    bias = b_ref[...]                    # (M, 1) f32
    L = row_chunk * Wp                   # GEMM N-dim per chunk (static)

    # Static unroll over row chunks: all slice starts are Python ints (no dynamic
    # lane-offset slicing).  After the polyphase rewrite + the VMEM budget below,
    # n_chunks is 1 for realistic shapes, so unrolling stays tiny.
    for c in range(n_chunks):
        base = c * L                     # == (c * row_chunk) * Wp
        if per_tap:
            # Large Cin: per-tap accumulating GEMMs, no slab copy at all.
            acc = None
            for t, (dh, dw) in enumerate(taps):
                start = base + dh * Wp + dw
                xs = x_ref[0, :, start:start + L]                     # (Ci, L)
                part = jnp.dot(w[:, t * Ci:(t + 1) * Ci], xs,
                               preferred_element_type=jnp.float32)
                acc = part if acc is None else acc + part
        else:
            # Small Cin: build the im2col slab with direct stores into VMEM scratch
            # (no jnp.concatenate temporaries), then one MXU GEMM per chunk.
            slab_ref = scratch[0]
            for t, (dh, dw) in enumerate(taps):
                start = base + dh * Wp + dw
                slab_ref[t * Ci:(t + 1) * Ci, :] = x_ref[0, :, start:start + L]
            acc = jnp.dot(w, slab_ref[...], preferred_element_type=jnp.float32)

        o_ref[0, :, base:base + L] = (acc + bias).astype(o_ref.dtype)


def norm_conv_transpose2d(x, w, b, *, stride=1, padding=0, norm_type="none",
                          compute_dtype=jnp.bfloat16,
                          vmem_target_bytes=48 * 1024 * 1024,
                          per_tap_min_cin=128):
    """Forward of NormConvTranspose2d (norm='none' -> ConvTranspose2d + Identity).

    x : [N, Cin, H, W]     (NCHW, like PyTorch)
    w : [Cin, Cout, K, K]  (PyTorch ConvTranspose2d weight layout)
    b : [Cout]
    compute_dtype: MXU dtype for x / weights (f32 accumulation); pass jnp.float32
                   (or None to follow x.dtype) for bit-closer numerics.
    """
    assert norm_type == "none"
    N, Ci, H, W = x.shape
    Ciw, Co, Kh, Kw = w.shape
    assert Ciw == Ci and Kh == Kw
    K = Kh
    s, p = int(stride), int(padding)

    Ho = (H - 1) * s - 2 * p + K
    Wo = (W - 1) * s - 2 * p + K
    assert Ho > 0 and Wo > 0

    cdt = x.dtype if compute_dtype is None else compute_dtype
    out_dtype = x.dtype

    # ---------------- static polyphase bookkeeping -----------------------------------
    axmap, off_min, Sh = _axis_phase_map(K, s, p)   # rows
    Sw = Sh                                          # square kernel, same padding
    taps = [(dh, dw) for dh in range(Sh) for dw in range(Sw)]
    n_taps = Sh * Sw
    M = s * s * Co                # phase-major output channels of the GEMM
    R = n_taps * Ci               # GEMM contraction depth

    Hq = -(-Ho // s)              # per-phase output rows / cols (quotient grid)
    Wq = -(-Wo // s)
    Wp = Wq + Sw - 1              # row pitch -> every tap is a contiguous flat slice

    per_tap = Ci >= per_tap_min_cin   # large-Cin: skip slab, per-tap accumulating GEMMs

    # ---------------- VMEM-budgeted row chunking --------------------------------------
    cbytes = jnp.dtype(cdt).itemsize
    obytes = jnp.dtype(out_dtype).itemsize
    acc_row = M * Wp * 4                                # f32 GEMM result per quotient row
    slab_row = 0 if per_tap else R * Wp * cbytes        # slab scratch per quotient row
    fixed = 2 * Ci * (Hq + Sh) * Wp * cbytes            # input block (double-buffered)
    fixed += 2 * (M * R * cbytes + M * 4)               # weight + bias blocks
    fixed += 2 * M * (Hq + 1) * Wp * obytes             # output block (double-buffered)
    avail = max(vmem_target_bytes - fixed, acc_row + slab_row)
    row_chunk = int(max(1, min(Hq, avail // max(acc_row + slab_row, 1))))
    row_chunk = min(Hq, max(row_chunk, -(-Hq // 64)))   # bound static unroll to <=64 chunks
    n_chunks = -(-Hq // row_chunk)
    Hq_alloc = n_chunks * row_chunk
    Hp = Hq_alloc + Sh             # +1 spare bottom row absorbs the last tap's wrap overrun

    # ---------------- pad the UN-dilated input (no stride zeros) ----------------------
    # x_pad[r, c] == x[r + off_min, c + off_min] with zeros (or crops) outside [0,H)x[0,W).
    top, left = -off_min, -off_min
    bottom, right = Hp - top - H, Wp - left - W         # may be negative (crop): safe,
    zero = jnp.zeros((), cdt)                           # cropped rows are never accessed.
    xpad = lax.pad(x.astype(cdt), zero,
                   [(0, 0, 0), (0, 0, 0), (top, bottom, 0), (left, right, 0)])
    xflat = xpad.reshape(N, Ci, Hp * Wp)

    # ---------------- polyphase-packed weight ------------------------------------------
    # Wbig[(rh*s + rw)*Co + co, (dh*Sw + dw)*Ci + ci] = w[ci, co, kh, kw]
    # where (rh, dh) is the phase / relative-offset of tap kh (kw likewise); unused
    # (phase, offset) slots stay zero, which also handles phases with fewer taps.
    wbig = jnp.zeros((M, R), dtype=cdt)
    for kh in range(K):
        rh, oh_ = axmap[kh]
        dh = oh_ - off_min
        for kw in range(K):
            rw, ow_ = axmap[kw]
            dw = ow_ - off_min
            rs = (rh * s + rw) * Co
            cs = (dh * Sw + dw) * Ci
            wbig = wbig.at[rs:rs + Co, cs:cs + Ci].set(w[:, :, kh, kw].T.astype(cdt))
    bbig = jnp.tile(b, s * s).reshape(M, 1).astype(jnp.float32)

    # ---------------- pallas_call -------------------------------------------------------
    kernel = functools.partial(_convt_kernel, taps=taps, Ci=Ci, Wp=Wp,
                               row_chunk=row_chunk, n_chunks=n_chunks, per_tap=per_tap)
    scratch_shapes = [] if per_tap else [pltpu.VMEM((R, row_chunk * Wp), cdt)]

    cost = pl.CostEstimate(
        flops=int(2 * N * M * R * Hq_alloc * Wp),
        transcendentals=0,
        bytes_accessed=int(xflat.size * cbytes + M * R * cbytes + M * 4
                           + N * M * Hq_alloc * Wp * obytes))
    vmem_need = fixed + row_chunk * (acc_row + slab_row)
    vmem_limit = int(min(max(32 * 1024 * 1024, vmem_need + 4 * 1024 * 1024),
                         96 * 1024 * 1024))

    out_flat = pl.pallas_call(
        kernel,
        out_shape=jax.ShapeDtypeStruct((N, M, Hq_alloc * Wp), out_dtype),
        grid=(N,),
        in_specs=[
            pl.BlockSpec((1, Ci, Hp * Wp), lambda n: (n, 0, 0)),
            pl.BlockSpec((M, R), lambda n: (0, 0)),
            pl.BlockSpec((M, 1), lambda n: (0, 0)),
        ],
        out_specs=pl.BlockSpec((1, M, Hq_alloc * Wp), lambda n: (n, 0, 0)),
        scratch_shapes=scratch_shapes,
        compiler_params=pltpu.CompilerParams(
            dimension_semantics=("parallel",),
            vmem_limit_bytes=vmem_limit),
        cost_estimate=cost,
    )(xflat, wbig, bbig)

    # ---------------- phase-major flat -> NCHW (depth-to-space + crop, wrapper side) ----
    o = out_flat.reshape(N, s, s, Co, Hq_alloc, Wp)[:, :, :, :, :Hq, :Wq]
    o = jnp.transpose(o, (0, 3, 4, 1, 5, 2)).reshape(N, Co, Hq * s, Wq * s)
    return o[:, :, :Ho, :Wo]          # norm == 'none' -> Identity


def _reference(x, w, b, *, stride, padding):
    """Pure-JAX (f32) reference for PyTorch F.conv_transpose2d semantics."""
    Ci, Co, K, _ = w.shape
    w_oihw = jnp.transpose(jnp.flip(w, axis=(2, 3)), (1, 0, 2, 3))  # [Co,Ci,K,K]
    pad = K - 1 - padding
    y = lax.conv_general_dilated(
        x, w_oihw,
        window_strides=(1, 1),
        padding=[(pad, pad), (pad, pad)],
        lhs_dilation=(stride, stride),
        dimension_numbers=("NCHW", "OIHW", "NCHW"),
    )
    return y + b.reshape(1, Co, 1, 1)


if __name__ == "__main__":
    N, Ci, Co = 2, 4, 8
    H = W = 16
    K, stride, padding = 3, 2, 1

    key = jax.random.PRNGKey(0)
    kw_, kb_, kx_ = jax.random.split(key, 3)
    bound = 1.0 / math.sqrt(Ci * K * K)
    w = jax.random.uniform(kw_, (Ci, Co, K, K), jnp.float32, -bound, bound)
    b = jax.random.uniform(kb_, (Co,), jnp.float32, -bound, bound)
    x = jax.random.normal(kx_, (N, Ci, H, W), jnp.float32)

    fwd = functools.partial(norm_conv_transpose2d, stride=stride,
                            padding=padding, norm_type="none")
    y = jax.jit(fwd)(x, w, b)
    y = jax.block_until_ready(y)

    y_ref = _reference(x, w, b, stride=stride, padding=padding)
    assert y.shape == y_ref.shape, (y.shape, y_ref.shape)
    # bf16 compute path (f32 accumulation) -> loosened tolerance vs the f32 reference.
    assert jnp.allclose(y, y_ref, atol=3e-2, rtol=3e-2), \
        float(jnp.max(jnp.abs(y - y_ref)))

    print("KERNEL_OK")
</pallas_src>

<mosaic_0001>
module attributes {stable_mosaic.version = 11 : i64} {
  func.func @_convt_kernel(%arg0: i32, %arg1: memref<1x4x306xbf16, #tpu.memory_space<vmem>>, %arg2: memref<32x16xbf16, #tpu.memory_space<vmem>>, %arg3: memref<32x1xf32, #tpu.memory_space<vmem>>, %arg4: memref<1x32x272xf32, #tpu.memory_space<vmem>>, %arg5: memref<16x272xbf16, #tpu.memory_space<vmem>>) attributes {dimension_semantics = [#tpu.dimension_semantics<parallel>], iteration_bounds = array<i64: 2>, scalar_prefetch = 0 : i64, scratch_operands = 1 : i64, tpu.core_type = #tpu.core_type<tc>, window_params = [{transform_indices = @transform_0, window_bounds = array<i64: 1, 4, 306>}, {pipeline_mode = #tpu.pipeline_mode<synchronous>, transform_indices = @transform_1, window_bounds = array<i64: 32, 16>}, {pipeline_mode = #tpu.pipeline_mode<synchronous>, transform_indices = @transform_2, window_bounds = array<i64: 32, 1>}, {transform_indices = @transform_3, window_bounds = array<i64: 1, 32, 272>}]} {
    %c0 = arith.constant 0 : index
    %c0_0 = arith.constant 0 : index
    %0 = vector.load %arg2[%c0, %c0_0] : memref<32x16xbf16, #tpu.memory_space<vmem>>, vector<32x16xbf16>
    %c0_1 = arith.constant 0 : index
    %c0_2 = arith.constant 0 : index
    %1 = vector.load %arg3[%c0_1, %c0_2] : memref<32x1xf32, #tpu.memory_space<vmem>>, vector<32x1xf32>
    %c0_3 = arith.constant 0 : index
    %c0_4 = arith.constant 0 : index
    %c0_5 = arith.constant 0 : index
    %2 = vector.load %arg1[%c0_3, %c0_4, %c0_5] : memref<1x4x306xbf16, #tpu.memory_space<vmem>>, vector<1x4x272xbf16>
    %3 = vector.shape_cast %2 : vector<1x4x272xbf16> to vector<4x272xbf16>
    %c0_6 = arith.constant 0 : index
    %c0_7 = arith.constant 0 : index
    %4 = vector.load %arg5[%c0_6, %c0_7] : memref<16x272xbf16, #tpu.memory_space<vmem>>, vector<4x272xbf16>
    tpu.vector_store %arg5[%c0_6, %c0_7], %3 {strides = array<i32>} : memref<16x272xbf16, #tpu.memory_space<vmem>>, vector<4x272xbf16>,
    %c0_8 = arith.constant 0 : index
    %c0_9 = arith.constant 0 : index
    %c1 = arith.constant 1 : index
    %5 = vector.load %arg1[%c0_8, %c0_9, %c1] : memref<1x4x306xbf16, #tpu.memory_space<vmem>>, vector<1x4x272xbf16>
    %6 = vector.shape_cast %5 : vector<1x4x272xbf16> to vector<4x272xbf16>
    %c4 = arith.constant 4 : index
    %c0_10 = arith.constant 0 : index
    %7 = vector.load %arg5[%c4, %c0_10] : memref<16x272xbf16, #tpu.memory_space<vmem>>, vector<4x272xbf16>
    tpu.vector_store %arg5[%c4, %c0_10], %6 {strides = array<i32>} : memref<16x272xbf16, #tpu.memory_space<vmem>>, vector<4x272xbf16>,
    %c0_11 = arith.constant 0 : index
    %c0_12 = arith.constant 0 : index
    %c17 = arith.constant 17 : index
    %8 = vector.load %arg1[%c0_11, %c0_12, %c17] : memref<1x4x306xbf16, #tpu.memory_space<vmem>>, vector<1x4x272xbf16>
    %9 = vector.shape_cast %8 : vector<1x4x272xbf16> to vector<4x272xbf16>
    %c8 = arith.constant 8 : index
    %c0_13 = arith.constant 0 : index
    %10 = vector.load %arg5[%c8, %c0_13] : memref<16x272xbf16, #tpu.memory_space<vmem>>, vector<4x272xbf16>
    tpu.vector_store %arg5[%c8, %c0_13], %9 {strides = array<i32>} : memref<16x272xbf16, #tpu.memory_space<vmem>>, vector<4x272xbf16>,
    %c0_14 = arith.constant 0 : index
    %c0_15 = arith.constant 0 : index
    %c18 = arith.constant 18 : index
    %11 = vector.load %arg1[%c0_14, %c0_15, %c18] : memref<1x4x306xbf16, #tpu.memory_space<vmem>>, vector<1x4x272xbf16>
    %12 = vector.shape_cast %11 : vector<1x4x272xbf16> to vector<4x272xbf16>
    %c12 = arith.constant 12 : index
    %c0_16 = arith.constant 0 : index
    %13 = vector.load %arg5[%c12, %c0_16] : memref<16x272xbf16, #tpu.memory_space<vmem>>, vector<4x272xbf16>
    tpu.vector_store %arg5[%c12, %c0_16], %12 {strides = array<i32>} : memref<16x272xbf16, #tpu.memory_space<vmem>>, vector<4x272xbf16>,
    %c0_17 = arith.constant 0 : index
    %c0_18 = arith.constant 0 : index
    %14 = vector.load %arg5[%c0_17, %c0_18] : memref<16x272xbf16, #tpu.memory_space<vmem>>, vector<16x272xbf16>
    %cst = arith.constant dense<0.000000e+00> : vector<32x272xf32>
    %15 = tpu.matmul %0, %14, %cst {dimension_numbers = #tpu.dot_dimension_numbers<[1], [0], [0], [1], [0, 0, 1, 1], [], []>} : vector<32x16xbf16>, vector<16x272xbf16>, vector<32x272xf32> -> vector<32x272xf32>
    %16 = vector.broadcast %1 : vector<32x1xf32> to vector<32x272xf32>
    %17 = arith.addf %15, %16 : vector<32x272xf32>
    %c0_19 = arith.constant 0 : index
    %c0_20 = arith.constant 0 : index
    %c0_21 = arith.constant 0 : index
    %18 = vector.load %arg4[%c0_19, %c0_20, %c0_21] : memref<1x32x272xf32, #tpu.memory_space<vmem>>, vector<1x32x272xf32>
    %19 = vector.shape_cast %18 : vector<1x32x272xf32> to vector<32x272xf32>
    %20 = vector.shape_cast %17 : vector<32x272xf32> to vector<1x32x272xf32>
    tpu.vector_store %arg4[%c0_19, %c0_20, %c0_21], %20 {strides = array<i32>} : memref<1x32x272xf32, #tpu.memory_space<vmem>>, vector<1x32x272xf32>,
    return
  }
  func.func @transform_0(%arg0: i32) -> (i32, i32, i32) {
    %c0_i32 = arith.constant 0 : i32
    %c0_i32_0 = arith.constant 0 : i32
    %c0_i32_1 = arith.constant 0 : i32
    return %arg0, %c0_i32, %c0_i32_0 : i32, i32, i32
  }
  func.func @transform_1(%arg0: i32) -> (i32, i32) {
    %c0_i32 = arith.constant 0 : i32
    %c0_i32_0 = arith.constant 0 : i32
    %c0_i32_1 = arith.constant 0 : i32
    return %c0_i32, %c0_i32_0 : i32, i32
  }
  func.func @transform_2(%arg0: i32) -> (i32, i32) {
    %c0_i32 = arith.constant 0 : i32
    %c0_i32_0 = arith.constant 0 : i32
    %c0_i32_1 = arith.constant 0 : i32
    return %c0_i32, %c0_i32_0 : i32, i32
  }
  func.func @transform_3(%arg0: i32) -> (i32, i32, i32) {
    %c0_i32 = arith.constant 0 : i32
    %c0_i32_0 = arith.constant 0 : i32
    %c0_i32_1 = arith.constant 0 : i32
    return %arg0, %c0_i32, %c0_i32_0 : i32, i32, i32
  }
}

</mosaic_0001>

<bundles_post_ra>
// kernel: tile.8
= control target key start
LH: loop header
LB: loop body
LE: loop exit
PB: predicated region body
PF: predicated region fallthrough
CT: control target
= control target key end

     0   :  { %s22_s0 = inlined_call_operand.vmem [shape: f32[8], index: 0, kind: input, shape index: {}]   ;;  %s23_s1 = inlined_call_operand.vmem [shape: f32[4,8], index: 1, kind: output, shape index: {}]  }
   0x1   :  { %v4_v0 = vld [vmem:[%s22_s0] ss:$0 sm:$0xff] }
   0x2   :  { %5 = vst [vmem:[%s23_s1] sm:$0xf] %v4_v0 }

// kernel: tile.0
= control target key start
LH: loop header
LB: loop body
LE: loop exit
PB: predicated region body
PF: predicated region fallthrough
CT: control target
= control target key end

     0   :  { %s66_s8 = smov 125   ;;  %s67_s9 = smov 123   ;;  %vm7_vm0 = vcmask 7168   ;;  %s117_s0 = inlined_call_operand.vmem [shape: f32[4,8], index: 0, kind: input, shape index: {}]   ;;  %s118_s1 = inlined_call_operand.vmem [shape: f32[32,1], index: 1, kind: output, shape index: {}]  }
   0x1   :  { %v4_v0 = vld [vmem:[%s117_s0] sm:$0xf]  ;;  %s65_s0 = smov 127   ;;  %s68_s10 = smov 126  }
   0x2   :  { %5 = vst [vmem:[#allocation0] sm:$0xf] %v4_v0  ;;  %s69_s11 = smov 124   ;;  %s70_s12 = smov 122  }
   0x3   :  { %s71_s13 = smov 121  }
   0x9   :  { %v9_v1 = vld [vmem:[#allocation0] sm:$0xf]  }
   0xa   :  { %v21_v2 = vld [vmem:[#allocation0] sm:$0xf]   ;;  %10 = vrot.lane.b32.xlu0 %v9_v1, %s65_s0 }
   0xb   :  { %22 = vrot.lane.b32.xlu1 %v21_v2, %s66_s8  ;;  %v33_v3 = vld [vmem:[#allocation0] sm:$0xf]  }
   0xc   :  { %34 = vrot.lane.b32.xlu2 %v33_v3, %s67_s9  ;;  %v15_v4 = vld [vmem:[#allocation0] sm:$0xf]  }
   0xd   :  { %v27_v5 = vld [vmem:[#allocation0] sm:$0xf]  }
   0xe   :  { %v39_v6 = vld [vmem:[#allocation0] sm:$0xf]  }
   0xf   :  { %v45_v7 = vld [vmem:[#allocation0] sm:$0xf]  }
  0x10   :  { %v6_v8 = vld [vmem:[#allocation0] sm:$0xf]  }
  0x11   :  { %8 = vst.msk [vmem:[%s118_s1] ss:$8 sm:$0xf] %vm7_vm0, %v6_v8  }
  0x12   :  { %16 = vrot.lane.b32.xlu0 %v15_v4, %s68_s10 }
  0x13   :  { %28 = vrot.lane.b32.xlu1 %v27_v5, %s69_s11 }
  0x14   :  { %40 = vrot.lane.b32.xlu2 %v39_v6, %s70_s12 }
  0x1a   :  { %46 = vrot.lane.b32.xlu0 %v45_v7, %s71_s13 }
  0x66   :  { %v35_v9 = vpop.permute.xlu2 %34  }
  0x67   :  { %55 = vst.msk [vmem:[%s118_s1 + $0x5] ss:$8 sm:$0xf] %vm7_vm0, %v35_v9  }
  0x6e   :  { %v41_v10 = vpop.permute.xlu2 %40  }
  0x6f   :  { %56 = vst.msk [vmem:[%s118_s1 + $0x6] ss:$8 sm:$0xf] %vm7_vm0, %v41_v10  }
  0x7c   :  { %v11_v11 = vpop.permute.xlu0 %10  }
  0x7d   :  { %v23_v12 = vpop.permute.xlu1 %22   ;;  %51 = vst.msk [vmem:[%s118_s1 + $0x1] ss:$8 sm:$0xf] %vm7_vm0, %v11_v11  }
  0x7e   :  { %53 = vst.msk [vmem:[%s118_s1 + $0x3] ss:$8 sm:$0xf] %vm7_vm0, %v23_v12  }
  0x84   :  { %v17_v13 = vpop.permute.xlu0 %16  }
  0x85   :  { %v29_v14 = vpop.permute.xlu1 %28   ;;  %52 = vst.msk [vmem:[%s118_s1 + $0x2] ss:$8 sm:$0xf] %vm7_vm0, %v17_v13  }
  0x86   :  { %54 = vst.msk [vmem:[%s118_s1 + $0x4] ss:$8 sm:$0xf] %vm7_vm0, %v29_v14  }
  0x8c   :  { %v47_v15 = vpop.permute.xlu0 %46  }
  0x8d   :  { %57 = vst.msk [vmem:[%s118_s1 + $0x7] ss:$8 sm:$0xf] %vm7_vm0, %v47_v15  }

// kernel: norm_conv_transpose2d.1
= control target key start
LH: loop header
LB: loop body
LE: loop exit
PB: predicated region body
PF: predicated region fallthrough
CT: control target
= control target key end

     0   :  { %s525_s12 = smov 0   ;;  %s593_s0 = inlined_call_operand.vmem [shape: bf16[2,4,306], index: 0, kind: input, shape index: {}]   ;;  %s594_s1 = inlined_call_operand.vmem [shape: bf16[32,16], index: 1, kind: input, shape index: {}]   ;;  %s595_s2 = inlined_call_operand.vmem [shape: f32[32,1], index: 2, kind: input, shape index: {}]   ;;  %s596_s3 = inlined_call_operand.vmem [shape: f32[2,32,272], index: 3, kind: output, shape index: {}]  }
   0x1 LB: > { %s435_s13 = sadd.s32 4294967295, %s499_s12   ;;  %p439_p0 = scmp.ge.s32.totalorder %s499_s12, 1  ;;  %s499_s12 = sphi %s525_s12, %s13_s12  }
   0x2   : > { %p137_p1 = scmp.lt.s32.totalorder %s499_s12, 3 }
   0x4   : > { %p138_p2 = pnand %p439_p0, %p137_p1 }
   0x5   : > { %p161_p3 = scmp.lt.s32.totalorder (!%p138_p2), %s435_s13, 1  ;;  %s501_s18 = smov (!%p138_p2), 127  }
   0x6   : > { %141 = sbr.rel (%p138_p2) target bundleno = 342 (0x156), region = 32  ;;  %s502_s19 = smov (!%p138_p2), 111  }
   0x7   : > { %s503_s20 = smov (!%p138_p2), 110  }
   0xb   : > { %s598_s13 = smov (!%p161_p3, %s435_s13), 1  ;;  %vm188_vm0 = vcmask 123904   ;;  %vm211_vm1 = vcmask 125954   ;;  %vm204_vm2 = vcmask 1043456   ;;  %vm227_vm3 = vcmask 908288   ;;  %v176_v20 = vld [vmem:[%s595_s2] sm:$0xff] }
   0xc   : > { %s476_s14 = smul.u32 6, %s598_s13  ;;  %v177_v21 = vld [vmem:[%s595_s2 + $0x8] sm:$0xff]  ;;  %v504_v23 = vmov 0   ;;  %vm248_vm4 = vcmask 900096   ;;  %vm206_vm5 = vcmask 1039360   ;;  %v470_v34 = vld [vmem:[%s594_s1] sm:$0xff] }
   0xd   : > { %490 = vset.pattern.permute.xlu0 %v504_v23  ;;  %491 = vset.pattern.permute.xlu1 %v504_v23  ;;  %vm304_vm6 = vcmask 130048   ;;  %v179_v36 = vld [vmem:[%s595_s2 + $0x18] sm:$0xff]  ;;  %v178_v37 = vld [vmem:[%s595_s2 + $0x10] sm:$0xff]  ;;  %v471_v45 = vld [vmem:[%s594_s1 + $0x8] sm:$0xff]  ;;  %s477_s6 = smul.u32 96, %s598_s13 }
   0xe   : > { %s165_s17 = scalar_lea.vmem %s593_s0, %s476_s14  ;;  %492 = vset.pattern.permute.xlu2 %v504_v23 }
   0xf   : > { %v180_v0 = vld [vmem:[%s165_s17] sm:$0x3f]  ;;  %s572_s9 = scalar_lea.vmem %s596_s3, %s477_s6 }
  0x10   : > { %182 = vst [vmem:[#allocation1] ss:$2 sm:$0xff] %v180_v0  ;;  %v190_v1 = vld [vmem:[%s165_s17] sm:$0x3f] }
  0x11   : > { %v213_v4 = vld [vmem:[%s165_s17] sm:$0x3f] }
  0x12   : > { %v233_v7 = vld [vmem:[%s165_s17] sm:$0x3f] }
  0x17   : > { %v183_v2 = vld.sshfl [vmem:[#allocation1] sm:$0xff pattern:$0x75643120]  ;;  %v184_v3 = vld.sshfl [vmem:[#allocation1 + $0x8] sm:$0xff pattern:$0x75643120] }
  0x18   : > { %193 = vst [vmem:[#allocation1 + $0x1] ss:$2 sm:$0xff] %v190_v1 }
  0x19   : > { %187 = vst [vmem:[#allocation2] sm:$0x33] %v183_v2 }
  0x1a   : > { %189 = vst.msk [vmem:[#allocation2 + $0x8] sm:$0x3] %vm188_vm0, %v184_v3 }
  0x1f   : > { %v196_v5 = vld.sshfl [vmem:[#allocation1 + $0x8] sm:$0xff pattern:$0x75643120]  ;;  %v194_v6 = vld.sshfl [vmem:[#allocation1] sm:$0xff pattern:$0x75643120] }
  0x20   : > { %200 = vrot.lane.b32.xlu0 %v196_v5, %s501_s18  ;;  %215 = vst [vmem:[#allocation1] ss:$2 sm:$0xff] %v213_v4 }
  0x27   : > { %v218_v8 = vld.sshfl [vmem:[#allocation1 + $0x8] sm:$0xff pattern:$0x75643120]  ;;  %v216_v9 = vld.sshfl [vmem:[#allocation1] sm:$0xff pattern:$0x75643120] }
  0x28   : > { %222 = vrot.lane.b32.xlu0 %v218_v8, %s502_s19  ;;  %236 = vst [vmem:[#allocation1 + $0x1] ss:$2 sm:$0xff] %v233_v7  ;;  %220 = vrot.lane.b32.xlu2 %v216_v9, %s502_s19 }
  0x2f   : > { %v239_v10 = vld.sshfl [vmem:[#allocation1 + $0x8] sm:$0xff pattern:$0x75643120]  ;;  %v237_v11 = vld.sshfl [vmem:[#allocation1] sm:$0xff pattern:$0x75643120] }
  0x30   : > { %243 = vrot.lane.b32.xlu1 %v239_v10, %s503_s20  ;;  %241 = vrot.lane.b32.xlu2 %v237_v11, %s503_s20 }
  0x31   : > { %260 = vperm.xlu0 %490, %v176_v20  }
  0x38   : > { %198 = vrot.lane.b32.xlu1 %v194_v6, %s501_s18  ;;  %270 = vperm.xlu2 %492, %v178_v37  }
  0x40   : > { %265 = vperm.xlu1 %491, %v177_v21  }
  0x48   : > { %275 = vperm.xlu1 %491, %v179_v36  }
  0x82   : > { %v221_v13 = vpop.permute.xlu2 %220 }
  0x83   : > { %v224_v14 = vrot.slane %v221_v13, 4 }
  0x8a   : > { %v242_v19 = vpop.permute.xlu2 %241 }
  0x8b   : > { %v245_v22 = vrot.slane %v242_v19, 4 }
  0x92   : > { %v201_v12 = vpop.permute.xlu0 %200  ;;  %v271_v56 = vpop.permute.xlu2 %270 }
  0x93   : > { %212 = vst.msk [vmem:[#allocation2 + $0x8] sm:$0xc] %vm211_vm1, %v201_v12  ;;  %v203_v31 = vrot.slane %v201_v12, 4 }
  0x9a   : > { %v223_v15 = vpop.permute.xlu0 %222  ;;  %v460_v29 = vld [vmem:[#allocation2 + $0x8] sm:$0xf] }
  0x9b   : > { %v225_v16 = vrot.slane %v223_v15, 4  ;;  %232 = vst.msk [vmem:[#allocation2 + $0x14] sm:$0x3] %vm188_vm0, %v223_v15 }
  0x9d   : > { %v226_v17 = vsel %vm204_vm2, %v224_v14, %v225_v16 }
  0x9e   : > { %v228_v18 = vsel %vm227_vm3, %v221_v13, %v226_v17 }
  0x9f   : > { %231 = vst [vmem:[#allocation2 + $0xc] sm:$0x33] %v228_v18 }
  0xa2   : > { %v244_v24 = vpop.permute.xlu1 %243 }
  0xa3   : > { %v246_v25 = vrot.slane %v244_v24, 4  ;;  %253 = vst.msk [vmem:[#allocation2 + $0x14] sm:$0xc] %vm211_vm1, %v244_v24  ;;  %v261_v46 = vpop.permute.xlu0 %260 }
  0xa5   : > { %v247_v26 = vsel %vm204_vm2, %v245_v22, %v246_v25 }
  0xa6   : > { %v249_v27 = vsel %vm248_vm4, %v242_v19, %v247_v26 }
  0xa7   : > { %252 = vst [vmem:[#allocation2 + $0xc] sm:$0xcc] %v249_v27 }
  0xaa   : > { %v199_v28 = vpop.permute.xlu1 %198  ;;  %v474_v30 = vld [vmem:[#allocation2 + $0x10] sm:$0xf0] }
  0xab   : > { %v202_v32 = vrot.slane %v199_v28, 4  ;;  %v461_v33 = vor.u32 %v474_v30, %v460_v29 }
  0xad   : > { %v205_v35 = vsel %vm204_vm2, %v202_v32, %v203_v31  ;;  %356 = vmatpush.bf16.msra.mxu2 %v461_v33 }
  0xae   : > { %v207_v38 = vsel %vm206_vm5, %v199_v28, %v205_v35  ;;  %v473_v39 = vld [vmem:[#allocation2 + $0x8] sm:$0xf0]  ;;  %v454_v42 = vld [vmem:[#allocation2 + $0xc] sm:$0xf0] }
  0xaf   : > { %210 = vst [vmem:[#allocation2] sm:$0xcc] %v207_v38 }
  0xb0   : > { %466 = vmatmul.msk.bf16.vlgmr.msra.gmra.mxu2 %vm304_vm6, %v470_v34 }
  0xb2   : > { %v266_v49 = vpop.permute.xlu1 %265 }
  0xb6   : > { %v452_v40 = vld [vmem:[#allocation2] sm:$0xf]  ;;  %v472_v41 = vld [vmem:[#allocation2 + $0x4] sm:$0xf] }
  0xb7   : > { %v453_v43 = vor.u32 %v473_v39, %v452_v40  ;;  %v457_v44 = vor.u32 %v472_v41, %v454_v42 }
  0xb9   : > { %318 = vmatpush.bf16.msra.mxu0 %v453_v43  ;;  %475 = vmatpush.bf16.msra.mxu3 %v453_v43 }
  0xba   : > { %337 = vmatpush.bf16.msra.mxu1 %v457_v44  ;;  %v276_v1 = vpop.permute.xlu1 %275 }
  0xbc   : > { %463 = vmatmul.msk.bf16.vlgmr.msra.gmra.mxu3 %vm304_vm6, %v471_v45  ;;  %462 = vmatmul.msk.bf16.vlgmr.msra.gmra.mxu0 %vm304_vm6, %v470_v34 }
  0xbd   : > { %464 = vmatmul.msk.bf16.vlgmr.msra.gmra.mxu1 %vm304_vm6, %v470_v34 }
  0xc0   : > { %467 = vmatmul.msk.bf16.gmra.mxu2 %vm304_vm6, %v471_v45 }
  0xcd   : > { %465 = vmatmul.msk.bf16.gmra.mxu1 %vm304_vm6, %v471_v45 }
 0x133   : > { %v358_v47 = vpop.f32.mrf.mxu2 }
 0x134   : > { %v359_v48 = vadd.f32 %v358_v47, %v261_v46 }
 0x136   : > { %370 = vst.msk [vmem:[%s572_s9 + $0x10] sm:$0xff] %vm304_vm6, %v359_v48 }
 0x139   : > { %v320_v50 = vpop.f32.mrf.mxu0 }
 0x13a   : > { %v339_v51 = vpop.f32.mrf.mxu1  ;;  %v321_v52 = vadd.f32 %v320_v50, %v261_v46 }
 0x13b   : > { %v340_v53 = vadd.f32 %v339_v51, %v261_v46  ;;  %v360_v54 = vpop.f32.mrf.mxu2 }
 0x13c   : > { %v361_v55 = vadd.f32 %v360_v54, %v266_v49  ;;  %368 = vst [vmem:[%s572_s9] sm:$0xff] %v321_v52 }
 0x13d   : > { %369 = vst [vmem:[%s572_s9 + $0x8] sm:$0xff] %v340_v53 }
 0x13e   : > { %373 = vst.msk [vmem:[%s572_s9 + $0x28] sm:$0xff] %vm304_vm6, %v361_v55 }
 0x13f   : > { %v325_v57 = vpop.f32.mrf.mxu3 }
 0x140   : > { %v326_v58 = vadd.f32 %v325_v57, %v271_v56 }
 0x141   : > { %v322_v59 = vpop.f32.mrf.mxu0 }
 0x142   : > { %v341_v60 = vpop.f32.mrf.mxu1  ;;  %374 = vst [vmem:[%s572_s9 + $0x30] sm:$0xff] %v326_v58  ;;  %v323_v61 = vadd.f32 %v322_v59, %v266_v49 }
 0x143   : > { %v342_v62 = vadd.f32 %v341_v60, %v266_v49  ;;  %v363_v63 = vpop.f32.mrf.mxu2 }
 0x144   : > { %v364_v0 = vadd.f32 %v363_v63, %v271_v56  ;;  %371 = vst [vmem:[%s572_s9 + $0x18] sm:$0xff] %v323_v61 }
 0x145   : > { %372 = vst [vmem:[%s572_s9 + $0x20] sm:$0xff] %v342_v62 }
 0x146   : > { %376 = vst.msk [vmem:[%s572_s9 + $0x40] sm:$0xff] %vm304_vm6, %v364_v0 }
 0x147   : > { %v327_v2 = vpop.f32.mrf.mxu3 }
 0x148   : > { %v328_v3 = vadd.f32 %v327_v2, %v276_v1 }
 0x14a   : > { %377 = vst [vmem:[%s572_s9 + $0x48] sm:$0xff] %v328_v3  ;;  %v344_v4 = vpop.f32.mrf.mxu1 }
 0x14b   : > { %v345_v5 = vadd.f32 %v344_v4, %v271_v56  ;;  %v365_v6 = vpop.f32.mrf.mxu2 }
 0x14c   : > { %v366_v7 = vadd.f32 %v365_v6, %v276_v1 }
 0x14d   : > { %375 = vst [vmem:[%s572_s9 + $0x38] sm:$0xff] %v345_v5 }
 0x14e   : > { %379 = vst.msk [vmem:[%s572_s9 + $0x58] sm:$0xff] %vm304_vm6, %v366_v7 }
 0x152   : > { %v346_v8 = vpop.f32.mrf.mxu1 }
 0x153   : > { %v347_v9 = vadd.f32 %v346_v8, %v276_v1 }
 0x155   : > { %378 = vst [vmem:[%s572_s9 + $0x50] sm:$0xff] %v347_v9 }
 0x156 PF: > { %s13_s12 = sadd.s32 1, %s499_s12  }
 0x157   : > { %p10_p4 = scmp.ge.s32.totalorder %s13_s12, 4  }
 0x159   :  { %12 = sbr.rel (!%p10_p4) target bundleno = 1 (0x1), region = 64 }

</bundles_post_ra>
